<compile_context>
chip_gen: v6e
topology: v6e:2x2x1
jax: 0.10.0
libtpu: 0.0.40
codegen_flags: <defaults>
</compile_context>

<pallas_src>
from functools import partial

import jax
import jax.numpy as jnp
import numpy as np
from jax import lax
from jax.experimental import pallas as pl
from jax.experimental.pallas import tpu as pltpu

_EPS = 1e-6
_COLS = 512            # lane-dense last axis (multiple of 128)


# ------------------------------------------------------------------ kernel ---
def _dice_partial_kernel(p_ref, g_ref, m_ref, o_ref):
    p = p_ref[...]
    g = g_ref[...]
    m = m_ref[...]

    gm = g * m
    inter = jnp.sum(p * gm)           # partial sum(pred * gt * mask)
    psum = jnp.sum(p * m)             # partial sum(pred * mask)
    gsum = jnp.sum(gm)                # partial sum(gt * mask)

    # Pack the three partial scalars into this block's lane-dense output tile
    # (same value replicated along sublanes; the JAX combine reads sublane 0).
    lane = lax.broadcasted_iota(jnp.int32, o_ref.shape, 2)
    vals = jnp.where(lane == 0, inter,
           jnp.where(lane == 1, psum,
           jnp.where(lane == 2, gsum, jnp.float32(0.0))))
    o_ref[...] = vals


# ----------------------------------------------------------------- tiling ----
def _tiling(total, tile_rows):
    rows = max(int(pl.cdiv(total, _COLS)), 1)
    rows = ((rows + 7) // 8) * 8                        # sublane-align
    tile_r = min(max((tile_rows // 8) * 8, 8), rows)    # multiple of 8
    rows = ((rows + tile_r - 1) // tile_r) * tile_r     # whole number of tiles
    return rows, tile_r


# ---------------------------------------------------------------- wrapper ----
@partial(jax.jit, static_argnames=("tile_rows",))
def dice_loss(pred_binary, gt, mask, *, tile_rows=512):
    """DBNet DiceLoss forward: returns (loss, {'dice_loss': loss})."""
    f32 = jnp.float32
    # dice_loss._compute squeezes the channel dim of 4-D pred/gt.
    pred = pred_binary[:, 0] if pred_binary.ndim == 4 else pred_binary
    g = gt[:, 0] if gt.ndim == 4 else gt
    pred = pred.astype(f32)
    g = g.astype(f32)
    m = mask.astype(f32)
    # TODO(synk): the optional `weights` argument of the inner DiceLoss is not
    # used by this module's forward and is not implemented here.

    total = pred.size
    rows, tile_r = _tiling(total, tile_rows)
    padded = rows * _COLS

    def _prep(x):
        x = x.reshape(-1)
        return jnp.pad(x, (0, padded - total)).reshape(rows, _COLS)

    p2, g2, m2 = _prep(pred), _prep(g), _prep(m)
    num_blocks = rows // tile_r

    partials = pl.pallas_call(
        _dice_partial_kernel,
        grid=(num_blocks,),
        in_specs=[pl.BlockSpec((tile_r, _COLS), lambda i: (i, 0))] * 3,
        out_specs=pl.BlockSpec((1, 8, 128), lambda i: (i, 0, 0)),
        out_shape=jax.ShapeDtypeStruct((num_blocks, 8, 128), f32),
        compiler_params=pltpu.CompilerParams(
            dimension_semantics=("parallel",)),
    )(p2, g2, m2)

    # Tiny final combine in plain JAX.
    sums = jnp.sum(partials[:, 0, :], axis=0)
    intersection = sums[0]
    union = sums[1] + sums[2] + _EPS
    loss = 1.0 - 2.0 * intersection / union
    return loss, dict(dice_loss=loss)


# ------------------------------------------------------ pure-JAX reference ---
def _reference(pred_binary, gt, mask, eps=_EPS):
    f32 = jnp.float32
    pred = pred_binary[:, 0].astype(f32)
    g = gt[:, 0].astype(f32)
    m = mask.astype(f32)
    inter = jnp.sum(pred * g * m)
    union = jnp.sum(pred * m) + jnp.sum(g * m) + eps
    loss = 1.0 - 2.0 * inter / union
    return loss, dict(dice_loss=loss)


if __name__ == "__main__":
    key = jax.random.PRNGKey(0)

    # Small shapes consistent with the module: pred/gt are NCHW (C=1), mask NHW.
    N, C, H, W = 2, 1, 16, 16
    k0, k1, k2 = jax.random.split(key, 3)
    pred_binary = jax.nn.sigmoid(jax.random.normal(k0, (N, C, H, W), jnp.float32))
    gt = (jax.random.uniform(k1, (N, C, H, W)) > 0.5).astype(jnp.float32)
    mask = (jax.random.uniform(k2, (N, H, W)) > 0.2).astype(jnp.float32)

    loss, metrics = dice_loss(pred_binary, gt, mask)
    jax.block_until_ready((loss, metrics))

    ref_loss, ref_metrics = _reference(pred_binary, gt, mask)
    np.testing.assert_allclose(np.asarray(loss), np.asarray(ref_loss),
                               rtol=2e-4, atol=1e-5)
    np.testing.assert_allclose(np.asarray(metrics["dice_loss"]),
                               np.asarray(ref_metrics["dice_loss"]),
                               rtol=2e-4, atol=1e-5)

    # Second check: force a multi-block grid (tile_rows=8 -> 2 grid steps) to
    # exercise the per-block partial-sum path and the "parallel" grid axis.
    N2, H2, W2 = 2, 64, 64
    k3, k4, k5 = jax.random.split(jax.random.PRNGKey(1), 3)
    pb2 = jax.nn.sigmoid(jax.random.normal(k3, (N2, 1, H2, W2), jnp.float32))
    gt2 = (jax.random.uniform(k4, (N2, 1, H2, W2)) > 0.5).astype(jnp.float32)
    m2 = (jax.random.uniform(k5, (N2, H2, W2)) > 0.2).astype(jnp.float32)

    loss2, _ = dice_loss(pb2, gt2, m2, tile_rows=8)
    jax.block_until_ready(loss2)
    ref2, _ = _reference(pb2, gt2, m2)
    np.testing.assert_allclose(np.asarray(loss2), np.asarray(ref2),
                               rtol=2e-4, atol=1e-5)

    print("KERNEL_OK")
</pallas_src>

<mosaic_0001>
module attributes {stable_mosaic.version = 11 : i64} {
  func.func @_dice_partial_kernel(%arg0: i32, %arg1: memref<8x512xf32, #tpu.memory_space<vmem>>, %arg2: memref<8x512xf32, #tpu.memory_space<vmem>>, %arg3: memref<8x512xf32, #tpu.memory_space<vmem>>, %arg4: memref<1x8x128xf32, #tpu.memory_space<vmem>>) attributes {dimension_semantics = [#tpu.dimension_semantics<parallel>], iteration_bounds = array<i64: 1>, scalar_prefetch = 0 : i64, scratch_operands = 0 : i64, tpu.core_type = #tpu.core_type<tc>, window_params = [{transform_indices = @transform_0, window_bounds = array<i64: 8, 512>}, {transform_indices = @transform_1, window_bounds = array<i64: 8, 512>}, {transform_indices = @transform_2, window_bounds = array<i64: 8, 512>}, {transform_indices = @transform_3, window_bounds = array<i64: 1, 8, 128>}]} {
    %c0 = arith.constant 0 : index
    %c0_0 = arith.constant 0 : index
    %0 = vector.load %arg1[%c0, %c0_0] : memref<8x512xf32, #tpu.memory_space<vmem>>, vector<8x512xf32>
    %c0_1 = arith.constant 0 : index
    %c0_2 = arith.constant 0 : index
    %1 = vector.load %arg2[%c0_1, %c0_2] : memref<8x512xf32, #tpu.memory_space<vmem>>, vector<8x512xf32>
    %c0_3 = arith.constant 0 : index
    %c0_4 = arith.constant 0 : index
    %2 = vector.load %arg3[%c0_3, %c0_4] : memref<8x512xf32, #tpu.memory_space<vmem>>, vector<8x512xf32>
    %3 = arith.mulf %1, %2 : vector<8x512xf32>
    %4 = arith.mulf %0, %3 : vector<8x512xf32>
    %5 = vector.shape_cast %4 : vector<8x512xf32> to vector<1x8x512xf32>
    %cst = arith.constant dense<0.000000e+00> : vector<1xf32>
    %6 = vector.multi_reduction <add>, %5, %cst [1, 2] : vector<1x8x512xf32> to vector<1xf32>
    %7 = vector.shape_cast %6 : vector<1xf32> to vector<1x1x1xf32>
    %8 = vector.extract %7[0, 0, 0] : f32 from vector<1x1x1xf32>
    %9 = arith.mulf %0, %2 : vector<8x512xf32>
    %10 = vector.shape_cast %9 : vector<8x512xf32> to vector<1x8x512xf32>
    %cst_5 = arith.constant dense<0.000000e+00> : vector<1xf32>
    %11 = vector.multi_reduction <add>, %10, %cst_5 [1, 2] : vector<1x8x512xf32> to vector<1xf32>
    %12 = vector.shape_cast %11 : vector<1xf32> to vector<1x1x1xf32>
    %13 = vector.extract %12[0, 0, 0] : f32 from vector<1x1x1xf32>
    %14 = vector.shape_cast %3 : vector<8x512xf32> to vector<1x8x512xf32>
    %cst_6 = arith.constant dense<0.000000e+00> : vector<1xf32>
    %15 = vector.multi_reduction <add>, %14, %cst_6 [1, 2] : vector<1x8x512xf32> to vector<1xf32>
    %16 = vector.shape_cast %15 : vector<1xf32> to vector<1x1x1xf32>
    %17 = vector.extract %16[0, 0, 0] : f32 from vector<1x1x1xf32>
    %18 = tpu.iota {dimensions = array<i32: 2>} : vector<1x8x128xi32>
    %c0_i32 = arith.constant 0 : i32
    %19 = vector.broadcast %c0_i32 : i32 to vector<1x8x128xi32>
    %20 = arith.cmpi eq, %18, %19 : vector<1x8x128xi32>
    %c1_i32 = arith.constant 1 : i32
    %21 = vector.broadcast %c1_i32 : i32 to vector<1x8x128xi32>
    %22 = arith.cmpi eq, %18, %21 : vector<1x8x128xi32>
    %c2_i32 = arith.constant 2 : i32
    %23 = vector.broadcast %c2_i32 : i32 to vector<1x8x128xi32>
    %24 = arith.cmpi eq, %18, %23 : vector<1x8x128xi32>
    %cst_7 = arith.constant 0.000000e+00 : f32
    %25 = vector.broadcast %17 : f32 to vector<1x8x128xf32>
    %26 = vector.broadcast %cst_7 : f32 to vector<1x8x128xf32>
    %27 = arith.select %24, %25, %26 : vector<1x8x128xi1>, vector<1x8x128xf32>
    %28 = vector.broadcast %13 : f32 to vector<1x8x128xf32>
    %29 = arith.select %22, %28, %27 : vector<1x8x128xi1>, vector<1x8x128xf32>
    %30 = vector.broadcast %8 : f32 to vector<1x8x128xf32>
    %31 = arith.select %20, %30, %29 : vector<1x8x128xi1>, vector<1x8x128xf32>
    %c0_8 = arith.constant 0 : index
    %c0_9 = arith.constant 0 : index
    %c0_10 = arith.constant 0 : index
    %32 = vector.load %arg4[%c0_8, %c0_9, %c0_10] : memref<1x8x128xf32, #tpu.memory_space<vmem>>, vector<1x8x128xf32>
    tpu.vector_store %arg4[%c0_8, %c0_9, %c0_10], %31 {strides = array<i32>} : memref<1x8x128xf32, #tpu.memory_space<vmem>>, vector<1x8x128xf32>,
    return
  }
  func.func @transform_0(%arg0: i32) -> (i32, i32) {
    %c0_i32 = arith.constant 0 : i32
    %c0_i32_0 = arith.constant 0 : i32
    return %arg0, %c0_i32 : i32, i32
  }
  func.func @transform_1(%arg0: i32) -> (i32, i32) {
    %c0_i32 = arith.constant 0 : i32
    %c0_i32_0 = arith.constant 0 : i32
    return %arg0, %c0_i32 : i32, i32
  }
  func.func @transform_2(%arg0: i32) -> (i32, i32) {
    %c0_i32 = arith.constant 0 : i32
    %c0_i32_0 = arith.constant 0 : i32
    return %arg0, %c0_i32 : i32, i32
  }
  func.func @transform_3(%arg0: i32) -> (i32, i32, i32) {
    %c0_i32 = arith.constant 0 : i32
    %c0_i32_0 = arith.constant 0 : i32
    %c0_i32_1 = arith.constant 0 : i32
    return %arg0, %c0_i32, %c0_i32_0 : i32, i32, i32
  }
}

</mosaic_0001>

<bundles_post_ra>
// kernel: squeeze.7
= control target key start
LH: loop header
LB: loop body
LE: loop exit
PB: predicated region body
PF: predicated region fallthrough
CT: control target
= control target key end

     0   :  { %s69_s8 = smov 112   ;;  %s70_s11 = smov 80   ;;  %vm3_vm0 = vcmask 130048   ;;  %vm9_vm1 = vcmask 1048448   ;;  %vm15_vm2 = vcmask 917248   ;;  %vm21_vm3 = vcmask 786048   ;;  %s113_s0 = inlined_call_operand.vmem [shape: f32[2,1,16,16], index: 0, kind: input, shape index: {}]   ;;  %s114_s1 = inlined_call_operand.vmem [shape: f32[512], index: 1, kind: output, shape index: {}]  }
   0x1   :  { %v55_v0 = vld [vmem:[%s113_s0 + $0x7] ss:$8 sm:$0xf]   ;;  %v57_v1 = vld [vmem:[%s113_s0 + $0x5] ss:$8 sm:$0xf]  }
   0x2   :  { %7 = vrot.lane.b32.xlu0 %v55_v0, %s69_s8  ;;  %19 = vrot.lane.b32.xlu1 %v57_v1, %s70_s11  ;;  %v56_v2 = vld [vmem:[%s113_s0 + $0x6] ss:$8 sm:$0xf]   ;;  %v58_v3 = vld [vmem:[%s113_s0 + $0x4] ss:$8 sm:$0xf]  }
   0x3   :  { %s71_s16 = smov 96   ;;  %v2_v4 = vld [vmem:[%s113_s0] ss:$8 sm:$0xf]   ;;  %s72_s19 = smov 64   ;;  %vm27_vm4 = vcmask 654848  }
   0x4   :  { %v59_v5 = vld [vmem:[%s113_s0 + $0x3] ss:$8 sm:$0xf]   ;;  %4 = vst.msk [vmem:[#allocation0] sm:$0xf] %vm3_vm0, %v2_v4   ;;  %s73_s24 = smov 48  }
   0x5   :  { %v60_v6 = vld [vmem:[%s113_s0 + $0x2] ss:$8 sm:$0xf]   ;;  %s74_s25 = smov 32   ;;  %vm33_vm5 = vcmask 523648   ;;  %vm39_vm6 = vcmask 392448  }
   0x6   :  { %13 = vrot.lane.b32.xlu0 %v56_v2, %s71_s16  ;;  %25 = vrot.lane.b32.xlu1 %v58_v3, %s72_s19  ;;  %v61_v7 = vld [vmem:[%s113_s0 + $0x1] ss:$8 sm:$0xf]   ;;  %s75_s0 = smov 16   ;;  %vm45_vm7 = vcmask 261248  }
   0xa   :  { %31 = vrot.lane.b32.xlu0 %v59_v5, %s73_s24  ;;  %37 = vrot.lane.b32.xlu1 %v60_v6, %s74_s25 }
   0xe   :  { %43 = vrot.lane.b32.xlu0 %v61_v7, %s75_s0 }
  0x74   :  { %v8_v8 = vpop.permute.xlu0 %7   ;;  %v20_v9 = vpop.permute.xlu1 %19  }
  0x75   :  { %10 = vst.msk [vmem:[#allocation0] sm:$0xf] %vm9_vm1, %v8_v8  }
  0x78   :  { %v14_v10 = vpop.permute.xlu0 %13   ;;  %v26_v11 = vpop.permute.xlu1 %25  }
  0x79   :  { %16 = vst.msk [vmem:[#allocation0] sm:$0xf] %vm15_vm2, %v14_v10  }
  0x7a   :  { %22 = vst.msk [vmem:[#allocation0] sm:$0xf] %vm21_vm3, %v20_v9  }
  0x7b   :  { %28 = vst.msk [vmem:[#allocation0] sm:$0xf] %vm27_vm4, %v26_v11  }
  0x7c   :  { %v32_v12 = vpop.permute.xlu0 %31   ;;  %v38_v13 = vpop.permute.xlu1 %37  }
  0x7d   :  { %34 = vst.msk [vmem:[#allocation0] sm:$0xf] %vm33_vm5, %v32_v12  }
  0x7e   :  { %40 = vst.msk [vmem:[#allocation0] sm:$0xf] %vm39_vm6, %v38_v13  }
  0x80   :  { %v44_v14 = vpop.permute.xlu0 %43  }
  0x81   :  { %46 = vst.msk [vmem:[#allocation0] sm:$0xf] %vm45_vm7, %v44_v14  }
  0x88   :  { %v51_v15 = vld [vmem:[#allocation0] sm:$0xf] }
  0x89   :  { %54 = vst [vmem:[%s114_s1] sm:$0xf] %v51_v15 }

// kernel: squeeze.6
= control target key start
LH: loop header
LB: loop body
LE: loop exit
PB: predicated region body
PF: predicated region fallthrough
CT: control target
= control target key end

     0   :  { %2 = vsyncpa [#allocation1], 0  ;;  %s96_s6 = smov [#allocation0]   ;;  %s120_s0 = inlined_call_operand.hbm [shape: f32[2,1,16,16], index: 0, kind: input, shape index: {}]   ;;  %s121_s1 = inlined_call_operand.vmem [shape: f32[512], index: 1, kind: output, shape index: {}]  }
   0x1   :  { %s7_s7 = sshll.u32 %s96_s6, 4  ;;  %s8_s7 = int_to_ptr.vmem [resolvable:$true] %s7_s7 }
   0x2   :  { %s82_s8 = scalar_lea.vmem %s8_s7, 512  ;;  %p87_p1 = scmp.lt.s32.totalorder %s8_s7, %s8_s7 }
   0x3   :  { %p83_p0 = scmp.ne.s32.totalorder %s8_s7, %s82_s8  ;;  %p88_p2 = scmp.lt.s32.totalorder %s82_s8, %s82_s8 }
   0x5   :  { %p89_p3 = por %p88_p2, %p87_p1 }
   0x7   :  { %p90_p4 = pnand %p89_p3, %p83_p0 }
   0x9   :  { %93 = shalt.err (!%p90_p4)
}
   0xa   :  { %10 = dma.hbm_to_vmem [thread:$0]  %s120_s0, 512, %s8_s7, [#allocation1]  }
   0xb   :  { %94 = dma.done.wait [#allocation1], 512  }
   0xc   :  { %95 = vsyncadd [#allocation1], 4294966784  ;;  %v16_v0 = vld [vmem:[#allocation0 + $0x7] ss:$8 sm:$0xf]   ;;  %s97_s0 = smov 112  }
   0xd   :  { %v28_v1 = vld [vmem:[#allocation0 + $0x5] ss:$8 sm:$0xf]   ;;  %17 = vrot.lane.b32.xlu0 %v16_v0, %s97_s0  ;;  %s98_s11 = smov 80   ;;  %vm13_vm0 = vcmask 130048   ;;  %s99_s12 = smov 96  }
   0xe   :  { %29 = vrot.lane.b32.xlu1 %v28_v1, %s98_s11  ;;  %v22_v2 = vld [vmem:[#allocation0 + $0x6] ss:$8 sm:$0xf]   ;;  %v34_v3 = vld [vmem:[#allocation0 + $0x4] ss:$8 sm:$0xf]  }
   0xf   :  { %v12_v4 = vld [vmem:[#allocation0] ss:$8 sm:$0xf]   ;;  %s100_s13 = smov 64   ;;  %s101_s14 = smov 48   ;;  %vm19_vm1 = vcmask 1048448  }
  0x10   :  { %14 = vst.msk [vmem:[#allocation2] sm:$0xf] %vm13_vm0, %v12_v4   ;;  %v40_v5 = vld [vmem:[#allocation0 + $0x3] ss:$8 sm:$0xf]   ;;  %s102_s15 = smov 32  }
  0x11   :  { %23 = vrot.lane.b32.xlu0 %v22_v2, %s99_s12  ;;  %v46_v6 = vld [vmem:[#allocation0 + $0x2] ss:$8 sm:$0xf]   ;;  %v52_v7 = vld [vmem:[#allocation0 + $0x1] ss:$8 sm:$0xf]  }
  0x12   :  { %35 = vrot.lane.b32.xlu1 %v34_v3, %s100_s13  ;;  %s103_s16 = smov 16   ;;  %vm25_vm2 = vcmask 917248   ;;  %vm31_vm3 = vcmask 786048   ;;  %vm37_vm4 = vcmask 654848   ;;  %vm43_vm5 = vcmask 523648  }
  0x13   :  { %vm49_vm6 = vcmask 392448   ;;  %vm55_vm7 = vcmask 261248  }
  0x15   :  { %41 = vrot.lane.b32.xlu0 %v40_v5, %s101_s14 }
  0x16   :  { %47 = vrot.lane.b32.xlu1 %v46_v6, %s102_s15 }
  0x19   :  { %53 = vrot.lane.b32.xlu0 %v52_v7, %s103_s16 }
  0x7f   :  { %v18_v8 = vpop.permute.xlu0 %17  }
  0x80   :  { %v30_v9 = vpop.permute.xlu1 %29   ;;  %20 = vst.msk [vmem:[#allocation2] sm:$0xf] %vm19_vm1, %v18_v8  }
  0x83   :  { %v24_v10 = vpop.permute.xlu0 %23  }
  0x84   :  { %v36_v11 = vpop.permute.xlu1 %35   ;;  %26 = vst.msk [vmem:[#allocation2] sm:$0xf] %vm25_vm2, %v24_v10  }
  0x85   :  { %32 = vst.msk [vmem:[#allocation2] sm:$0xf] %vm31_vm3, %v30_v9  }
  0x86   :  { %38 = vst.msk [vmem:[#allocation2] sm:$0xf] %vm37_vm4, %v36_v11  }
  0x87   :  { %v42_v12 = vpop.permute.xlu0 %41  }
  0x88   :  { %v48_v13 = vpop.permute.xlu1 %47   ;;  %44 = vst.msk [vmem:[#allocation2] sm:$0xf] %vm43_vm5, %v42_v12  }
  0x89   :  { %50 = vst.msk [vmem:[#allocation2] sm:$0xf] %vm49_vm6, %v48_v13  }
  0x8b   :  { %v54_v14 = vpop.permute.xlu0 %53  }
  0x8c   :  { %56 = vst.msk [vmem:[#allocation2] sm:$0xf] %vm55_vm7, %v54_v14  }
  0x93   :  { %v61_v15 = vld [vmem:[#allocation2] sm:$0xf] }
  0x94   :  { %64 = vst [vmem:[%s121_s1] sm:$0xf] %v61_v15 }
  0x95   :  { %65 = vsyncpa [#allocation1], 1 }

// kernel: dice_loss.1
= control target key start
LH: loop header
LB: loop body
LE: loop exit
PB: predicated region body
PF: predicated region fallthrough
CT: control target
= control target key end

     0   :  { %v74_v54 = vlaneseq  ;;  %s155_s1 = inlined_call_operand.vmem [shape: f32[8,512], index: 1, kind: input, shape index: {}]   ;;  %s156_s2 = inlined_call_operand.vmem [shape: f32[8,512], index: 2, kind: input, shape index: {}]   ;;  %s157_s0 = inlined_call_operand.vmem [shape: f32[8,512], index: 0, kind: input, shape index: {}]   ;;  %s158_s3 = inlined_call_operand.vmem [shape: f32[1,8,128], index: 3, kind: output, shape index: {}]  }
   0x1   :  { %v18_v0 = vld [vmem:[%s155_s1] sm:$0xff]  ;;  %v19_v1 = vld [vmem:[%s155_s1 + $0x8] sm:$0xff]  ;;  %v20_v2 = vld [vmem:[%s155_s1 + $0x10] sm:$0xff] }
   0x2   :  { %v21_v3 = vld [vmem:[%s155_s1 + $0x18] sm:$0xff]  ;;  %v22_v4 = vld [vmem:[%s156_s2] sm:$0xff]  ;;  %v23_v5 = vld [vmem:[%s156_s2 + $0x8] sm:$0xff]  ;;  %v75_v55 = vand.u32 127, %v74_v54 }
   0x3   :  { %v24_v6 = vld [vmem:[%s156_s2 + $0x10] sm:$0xff]  ;;  %v25_v7 = vld [vmem:[%s156_s2 + $0x18] sm:$0xff]  ;;  %v26_v8 = vmul.f32 %v22_v4, %v18_v0  ;;  %v27_v9 = vmul.f32 %v23_v5, %v19_v1  ;;  %v14_v10 = vld [vmem:[%s157_s0] sm:$0xff] }
   0x4   :  { %v28_v11 = vmul.f32 %v24_v6, %v20_v2  ;;  %v29_v12 = vmul.f32 %v25_v7, %v21_v3  ;;  %v15_v13 = vld [vmem:[%s157_s0 + $0x8] sm:$0xff]  ;;  %v16_v14 = vld [vmem:[%s157_s0 + $0x10] sm:$0xff]  ;;  %v17_v15 = vld [vmem:[%s157_s0 + $0x18] sm:$0xff]  ;;  %v46_v16 = vmul.f32 %v22_v4, %v14_v10  ;;  %vm78_vm0 = vcmp.eq.s32.totalorder %v75_v55, 2 }
   0x5   :  { %v62_v17 = vadd.f32 %v27_v9, %v26_v8  ;;  %v30_v18 = vmul.f32 %v26_v8, %v14_v10  ;;  %v31_v19 = vmul.f32 %v27_v9, %v15_v13  ;;  %v47_v20 = vmul.f32 %v23_v5, %v15_v13 }
   0x6   :  { %v32_v21 = vmul.f32 %v28_v11, %v16_v14  ;;  %v48_v22 = vmul.f32 %v24_v6, %v16_v14  ;;  %v33_v24 = vmul.f32 %v29_v12, %v17_v15  ;;  %v49_v29 = vmul.f32 %v25_v7, %v17_v15 }
   0x7   :  { %v63_v23 = vadd.f32 %v62_v17, %v28_v11  ;;  %v34_v25 = vadd.f32 %v31_v19, %v30_v18  ;;  %v50_v26 = vadd.f32 %v47_v20, %v46_v16  ;;  %vm77_vm1 = vcmp.eq.s32.totalorder %v75_v55, 1 }
   0x8   :  { %vm76_vm2 = vcmp.eq.s32.totalorder %v75_v55, 0 }
   0x9   :  { %v64_v27 = vadd.f32 %v63_v23, %v29_v12  ;;  %v35_v28 = vadd.f32 %v34_v25, %v32_v21  ;;  %v51_v30 = vadd.f32 %v50_v26, %v48_v22 }
   0xb   :  { %65 = vadd.xlane.f32.xlu1 %v64_v27  ;;  %v36_v31 = vadd.f32 %v35_v28, %v33_v24  ;;  %v52_v32 = vadd.f32 %v51_v30, %v49_v29 }
   0xd   :  { %37 = vadd.xlane.f32.xlu0 %v36_v31 }
  0x11   :  { %53 = vadd.xlane.f32.xlu0 %v52_v32 }
  0x94   :  { %v66_v33 = vpop.xlane.xlu1 %65 }
  0x95   :  { %v67_v34 = vrot.slane %v66_v33, 4 }
  0x96   :  { %v38_v35 = vpop.xlane.xlu0 %37 }
  0x97   :  { %v68_v36 = vadd.f32 %v67_v34, %v66_v33  ;;  %v39_v37 = vrot.slane %v38_v35, 4 }
  0x99   :  { %v40_v38 = vadd.f32 %v39_v37, %v38_v35  ;;  %v69_v39 = vrot.slane %v68_v36, 2 }
  0x9a   :  { %v54_v40 = vpop.xlane.xlu0 %53 }
  0x9b   :  { %v41_v41 = vrot.slane %v40_v38, 2  ;;  %v55_v42 = vrot.slane %v54_v40, 4  ;;  %v70_v45 = vadd.f32 %v69_v39, %v68_v36 }
  0x9d   :  { %v56_v43 = vadd.f32 %v55_v42, %v54_v40  ;;  %v42_v44 = vadd.f32 %v41_v41, %v40_v38  ;;  %v71_v50 = vrot.slane %v70_v45, 1 }
  0x9f   :  { %v57_v46 = vrot.slane %v56_v43, 2  ;;  %v43_v47 = vrot.slane %v42_v44, 1  ;;  %v72_v53 = vadd.f32 %v71_v50, %v70_v45 }
  0xa1   :  { %v58_v48 = vadd.f32 %v57_v46, %v56_v43  ;;  %v44_v49 = vadd.f32 %v43_v47, %v42_v44 }
  0xa3   :  { %90 = vpush %v44_v49  ;;  %v59_v51 = vrot.slane %v58_v48, 1 }
  0xa5   :  { %v60_v52 = vadd.f32 %v59_v51, %v58_v48 }
  0xa7   :  { %92 = vpush %v60_v52 }
  0xa8   :  { %94 = vpush %v72_v53 }
  0xd4   :  { %s91_s0 = spop %90 }
  0xd5   :  { %v83_v59 = vstv %s91_s0 }
  0xd8   :  { %s93_s2 = spop %92 }
  0xd9   :  { %v81_v56 = vstv %s93_s2  ;;  %s95_s8 = spop %94 }
  0xda   :  { %v79_v57 = vstv %s95_s8 }
  0xdb   :  { %v80_v58 = vsel %vm78_vm0, %v79_v57, 0.0 }
  0xdc   :  { %v82_v60 = vsel %vm77_vm1, %v81_v56, %v80_v58 }
  0xdd   :  { %v84_v61 = vsel %vm76_vm2, %v83_v59, %v82_v60 }
  0xde   :  { %85 = vst [vmem:[%s158_s3] sm:$0xff] %v84_v61 }

</bundles_post_ra>
